<compile_context>
chip_gen: v5e
topology: v5e:2x2
jax: 0.10.0
libtpu: 0.0.40
codegen_flags: <defaults>
</compile_context>

<pallas_src>
import math
import functools

import jax
import jax.numpy as jnp
from jax import lax
from jax.experimental import pallas as pl
from jax.experimental.pallas import tpu as pltpu

LAYER_SIZE = 128            # H
HID1 = 2 * LAYER_SIZE       # 256  (layer-1 width of each net)
OUT_LANES = 128             # lane-dense fused output slab width
LOG_2PI = math.log(2.0 * math.pi)
TILE_MULT = 16              # bf16 sublane packing (also a multiple of f32's 8)


def _prelu(h, a):
    # nn.PReLU() with learnable slope `a` (torch default init 0.25)
    return jnp.where(h > 0, h, a * h)


def _round_up(x, m):
    return ((x + m - 1) // m) * m


def actor_critic_kernel(
    # batch-tiled inputs (compute dtype: bf16 on fast path, f32 on exact path)
    state_ref, action_ref,               # [TB, S], [TB, OUT_LANES] (action lane-padded with 0)
    # resident parameters (constant index_map)
    w1_ref, b1_ref, alpha1_ref,          # fused layer 1: [S, 2*HID1] cdt, [1, 2*HID1] f32, [1, 2*HID1] f32
    aw2_ref, ab2_ref, a_alpha2_ref,      # actor  layer 2: [HID1, H] cdt, [1, H] f32, [1, H] f32
    cw2_ref, cb2_ref, c_alpha2_ref,      # critic layer 2: [HID1, H] cdt, [1, H] f32, [1, H] f32
    w3a_ref, w3c_ref, b3_ref,            # layer 3: [H, OUT_LANES] cdt x2, [1, OUT_LANES] f32
    inv_var_ref, logp_const_ref,         # [1, OUT_LANES] (0 past action_dim), [1, 1]
    # output
    out_ref,                             # [TB, OUT_LANES] f32
    *, action_dim: int, compute_dtype,
):
    x = state_ref[...]                                              # [TB, S] cdt

    # ---- fused layer 1 (actor || critic share x), f32 accumulation ----
    hg = jnp.dot(x, w1_ref[...], preferred_element_type=jnp.float32) + b1_ref[...]
    hg = _prelu(hg, alpha1_ref[...])                                # f32, per-column slope

    h = hg[:, :HID1].astype(compute_dtype)                          # lane-aligned slice [TB, 256]
    g = hg[:, HID1:].astype(compute_dtype)                          # [TB, 256]

    # ---- layer 2 (separate dots; block-diag fusion only pays on 256-wide MXUs) ----
    h2 = _prelu(jnp.dot(h, aw2_ref[...], preferred_element_type=jnp.float32) + ab2_ref[...],
                a_alpha2_ref[...])                                  # [TB, 128] f32
    g2 = _prelu(jnp.dot(g, cw2_ref[...], preferred_element_type=jnp.float32) + cb2_ref[...],
                c_alpha2_ref[...])                                  # [TB, 128] f32

    # ---- layer 3: two accumulating K=128 dots (no concat / lane relayout) ----
    pre = (jnp.dot(h2.astype(compute_dtype), w3a_ref[...], preferred_element_type=jnp.float32)
           + jnp.dot(g2.astype(compute_dtype), w3c_ref[...], preferred_element_type=jnp.float32)
           + b3_ref[...])
    # pre cols [0, A): actor head (pre-tanh); col A: critic value; rest: 0

    col = lax.broadcasted_iota(jnp.int32, pre.shape, 1)
    is_mean = col < action_dim
    is_value = col == action_dim
    is_logp = col == action_dim + 1

    mean_slab = jnp.where(is_mean, jnp.tanh(pre), 0.0)              # mean in cols [0,A), else 0

    # diagonal-Gaussian log_prob; inv_var is 0 on padding lanes -> no contribution
    diff = action_ref[...].astype(jnp.float32) - mean_slab
    maha = jnp.sum(diff * diff * inv_var_ref[...], axis=-1, keepdims=True)   # [TB, 1]
    logp = logp_const_ref[0, 0] - 0.5 * maha                        # [TB, 1]

    # compose lane-dense output slab (single unmasked 128-lane store stream)
    out_ref[...] = (mean_slab
                    + jnp.where(is_value, pre, 0.0)
                    + jnp.where(is_logp, logp, 0.0))


def actor_critic_eval(state, action, params, action_var, *, action_dim,
                      batch_tile=2048, use_bf16=True):
    """Pallas ActorCritic.eval(state, action) (+ action_mean).

    Returns (action_mean [B,A], state_value [B], log_prob [B], entropy [B]).
    """
    B, S = state.shape
    A = action_dim
    H = LAYER_SIZE
    assert A + 2 <= OUT_LANES, "action_dim must leave room for value/logp lanes"

    cdt = jnp.bfloat16 if use_bf16 else jnp.float32

    # Batch tiling: cap the tile at ~half the (rounded) batch so the grid has
    # >= 2 steps when B allows it -> the "parallel" axis can use both v7x TCs.
    # At TB=2048 the f32 intermediates (hg = TB x 512 x 4B etc.) plus bf16 I/O
    # double-buffers stay well under the 32 MiB scoped VMEM limit (v7x-safe).
    half = _round_up(max(1, (B + 1) // 2), TILE_MULT)
    tb = max(TILE_MULT, min(batch_tile, half))
    bp = _round_up(B, tb)

    state_p = jnp.pad(state.astype(jnp.float32), ((0, bp - B), (0, 0))).astype(cdt)
    action_p = jnp.pad(action.astype(jnp.float32),
                       ((0, bp - B), (0, OUT_LANES - A))).astype(cdt)

    # ---- fused / padded parameters (one-time wrapper work; weights cast to cdt) ----
    w1 = jnp.concatenate([params["aw1"], params["cw1"]], axis=1).astype(cdt)     # [S, 2*HID1]
    b1 = jnp.concatenate([params["ab1"], params["cb1"]], axis=1)                 # [1, 2*HID1] f32
    alpha1 = jnp.concatenate(
        [jnp.broadcast_to(params["a_alpha1"], (1, HID1)),
         jnp.broadcast_to(params["c_alpha1"], (1, HID1))], axis=1)               # [1, 2*HID1] f32

    aw2 = params["aw2"].astype(cdt)
    cw2 = params["cw2"].astype(cdt)
    a_alpha2 = jnp.broadcast_to(params["a_alpha2"], (1, H)).astype(jnp.float32)
    c_alpha2 = jnp.broadcast_to(params["c_alpha2"], (1, H)).astype(jnp.float32)

    w3a = jnp.zeros((H, OUT_LANES), jnp.float32).at[:, :A].set(params["aw3"]).astype(cdt)
    w3c = jnp.zeros((H, OUT_LANES), jnp.float32).at[:, A].set(params["cw3"][:, 0]).astype(cdt)
    b3 = jnp.zeros((1, OUT_LANES), jnp.float32)
    b3 = b3.at[0, :A].set(params["ab3"][0]).at[0, A].set(params["cb3"][0, 0])

    var = jnp.asarray(action_var, jnp.float32).reshape(1, A)
    inv_var = jnp.zeros((1, OUT_LANES), jnp.float32).at[:, :A].set(1.0 / var)
    sum_log_var = jnp.sum(jnp.log(var))
    logp_const = (-0.5 * (A * LOG_2PI + sum_log_var)).reshape(1, 1)

    batch_inputs = (state_p, action_p)
    const_inputs = (w1, b1, alpha1,
                    aw2, params["ab2"], a_alpha2,
                    cw2, params["cb2"], c_alpha2,
                    w3a, w3c, b3, inv_var, logp_const)

    in_specs = ([pl.BlockSpec((tb, S), lambda i: (i, 0)),
                 pl.BlockSpec((tb, OUT_LANES), lambda i: (i, 0))]
                + [pl.BlockSpec(x.shape, lambda i: (0, 0)) for x in const_inputs])
    out_spec = pl.BlockSpec((tb, OUT_LANES), lambda i: (i, 0))
    # TODO(synk): constant-param specs could add pipeline_mode=pl.Buffered(1) and
    # logp_const could live in SMEM — skipped as micro VMEM wins.

    in_bytes = 2 if use_bf16 else 4
    weight_bytes = sum(int(x.size) * int(jnp.asarray(x).dtype.itemsize) for x in const_inputs)
    cost = pl.CostEstimate(
        flops=2 * bp * (S * 2 * HID1 + 2 * HID1 * H + 2 * H * OUT_LANES),
        transcendentals=bp * OUT_LANES,
        bytes_accessed=bp * (S + OUT_LANES) * in_bytes + 4 * bp * OUT_LANES + weight_bytes,
    )

    out = pl.pallas_call(
        functools.partial(actor_critic_kernel, action_dim=A, compute_dtype=cdt),
        out_shape=jax.ShapeDtypeStruct((bp, OUT_LANES), jnp.float32),
        grid=(bp // tb,),
        in_specs=in_specs,
        out_specs=out_spec,
        compiler_params=pltpu.CompilerParams(
            dimension_semantics=("parallel",),
            vmem_limit_bytes=32 * 1024 * 1024),
        cost_estimate=cost,
    )(*batch_inputs, *const_inputs)

    mean = out[:B, :A]
    value = out[:B, A]
    logp = out[:B, A + 1]
    # entropy of a fixed-covariance diagonal Gaussian is batch-independent.
    entropy = jnp.broadcast_to(0.5 * A * (1.0 + LOG_2PI) + 0.5 * sum_log_var, (B,))
    return mean, value, logp, entropy


# ------------------- deterministic parameter init -------------------
def _linear_init(key, fan_in, fan_out):
    kw, kb = jax.random.split(key)
    bound = 1.0 / math.sqrt(fan_in)
    w = jax.random.uniform(kw, (fan_in, fan_out), jnp.float32, -bound, bound)
    b = jax.random.uniform(kb, (1, fan_out), jnp.float32, -bound, bound)
    return w, b


def init_actor_critic_params(key, state_dim, action_dim):
    keys = jax.random.split(key, 6)
    aw1, ab1 = _linear_init(keys[0], state_dim, HID1)
    aw2, ab2 = _linear_init(keys[1], HID1, LAYER_SIZE)
    aw3, ab3 = _linear_init(keys[2], LAYER_SIZE, action_dim)
    cw1, cb1 = _linear_init(keys[3], state_dim, HID1)
    cw2, cb2 = _linear_init(keys[4], HID1, LAYER_SIZE)
    cw3, cb3 = _linear_init(keys[5], LAYER_SIZE, 1)
    prelu = jnp.full((1, 1), 0.25, jnp.float32)  # nn.PReLU default
    return dict(
        aw1=aw1, ab1=ab1, aw2=aw2, ab2=ab2, aw3=aw3, ab3=ab3,
        a_alpha1=prelu, a_alpha2=prelu,
        cw1=cw1, cb1=cb1, cw2=cw2, cb2=cb2, cw3=cw3, cb3=cb3,
        c_alpha1=prelu, c_alpha2=prelu,
    )


# ------------------- pure-JAX reference for checking -------------------
def _reference(state, action, p, action_var, action_dim):
    def prelu(h, a):
        return jnp.where(h > 0, h, a * h)

    h = prelu(state @ p["aw1"] + p["ab1"], p["a_alpha1"][0, 0])
    h = prelu(h @ p["aw2"] + p["ab2"], p["a_alpha2"][0, 0])
    mean = jnp.tanh(h @ p["aw3"] + p["ab3"])

    g = prelu(state @ p["cw1"] + p["cb1"], p["c_alpha1"][0, 0])
    g = prelu(g @ p["cw2"] + p["cb2"], p["c_alpha2"][0, 0])
    value = jnp.squeeze(g @ p["cw3"] + p["cb3"], -1)

    var = jnp.asarray(action_var, jnp.float32)
    diff = action - mean
    logp = (-0.5 * jnp.sum(diff * diff / var, -1)
            - 0.5 * jnp.sum(jnp.log(var))
            - 0.5 * action_dim * LOG_2PI)
    ent = jnp.full((state.shape[0],),
                   0.5 * action_dim * (1.0 + LOG_2PI) + 0.5 * jnp.sum(jnp.log(var)))
    return mean, value, logp, ent


if __name__ == "__main__":
    B, STATE_DIM, ACTION_DIM = 8, 16, 4
    ACTION_STD = 0.5

    key = jax.random.PRNGKey(0)
    k_params, k_state, k_action = jax.random.split(key, 3)

    params = init_actor_critic_params(k_params, STATE_DIM, ACTION_DIM)
    action_var = jnp.full((ACTION_DIM,), ACTION_STD * ACTION_STD, jnp.float32)

    state = jax.random.normal(k_state, (B, STATE_DIM), jnp.float32)
    action = jax.random.normal(k_action, (B, ACTION_DIM), jnp.float32)

    r_mean, r_value, r_logp, r_ent = _reference(
        state, action, params, action_var, ACTION_DIM)

    # ---- exact f32 path (semantics check, tight tolerances) ----
    mean, value, logp, ent = actor_critic_eval(
        state, action, params, action_var, action_dim=ACTION_DIM, use_bf16=False)
    jax.block_until_ready((mean, value, logp, ent))
    assert jnp.allclose(mean, r_mean, atol=1e-5), "action_mean mismatch (f32)"
    assert jnp.allclose(value, r_value, atol=1e-5), "state_value mismatch (f32)"
    assert jnp.allclose(logp, r_logp, atol=1e-4), "log_prob mismatch (f32)"
    assert jnp.allclose(ent, r_ent, atol=1e-5), "entropy mismatch (f32)"

    # ---- fast bf16-matmul path (f32 accumulation & element-wise math) ----
    mean_b, value_b, logp_b, ent_b = actor_critic_eval(
        state, action, params, action_var, action_dim=ACTION_DIM, use_bf16=True)
    jax.block_until_ready((mean_b, value_b, logp_b, ent_b))
    assert jnp.allclose(mean_b, r_mean, atol=5e-2), "action_mean mismatch (bf16)"
    assert jnp.allclose(value_b, r_value, atol=5e-2), "state_value mismatch (bf16)"
    assert jnp.allclose(logp_b, r_logp, atol=5e-1), "log_prob mismatch (bf16)"
    assert jnp.allclose(ent_b, r_ent, atol=1e-5), "entropy mismatch (bf16)"

    # TODO(synk): `act()` sampling (MultivariateNormal.sample) is stochastic; it
    # could be added with pltpu.prng_seed/stateful_normal but is omitted to keep
    # the kernel deterministic and verifiable.

    print("KERNEL_OK")
</pallas_src>

<mosaic_0001>
module attributes {stable_mosaic.version = 11 : i64} {
  func.func @actor_critic_kernel(%arg0: i32, %arg1: memref<16x16xf32, #tpu.memory_space<vmem>>, %arg2: memref<16x128xf32, #tpu.memory_space<vmem>>, %arg3: memref<16x512xf32, #tpu.memory_space<vmem>>, %arg4: memref<1x512xf32, #tpu.memory_space<vmem>>, %arg5: memref<1x512xf32, #tpu.memory_space<vmem>>, %arg6: memref<256x128xf32, #tpu.memory_space<vmem>>, %arg7: memref<1x128xf32, #tpu.memory_space<vmem>>, %arg8: memref<1x128xf32, #tpu.memory_space<vmem>>, %arg9: memref<256x128xf32, #tpu.memory_space<vmem>>, %arg10: memref<1x128xf32, #tpu.memory_space<vmem>>, %arg11: memref<1x128xf32, #tpu.memory_space<vmem>>, %arg12: memref<128x128xf32, #tpu.memory_space<vmem>>, %arg13: memref<128x128xf32, #tpu.memory_space<vmem>>, %arg14: memref<1x128xf32, #tpu.memory_space<vmem>>, %arg15: memref<1x128xf32, #tpu.memory_space<vmem>>, %arg16: memref<1x1xf32, #tpu.memory_space<vmem>>, %arg17: memref<16x128xf32, #tpu.memory_space<vmem>>) attributes {dimension_semantics = [#tpu.dimension_semantics<parallel>], iteration_bounds = array<i64: 1>, scalar_prefetch = 0 : i64, scratch_operands = 0 : i64, tpu.core_type = #tpu.core_type<tc>, window_params = [{transform_indices = @transform_0, window_bounds = array<i64: 16, 16>}, {transform_indices = @transform_1, window_bounds = array<i64: 16, 128>}, {pipeline_mode = #tpu.pipeline_mode<synchronous>, transform_indices = @transform_2, window_bounds = array<i64: 16, 512>}, {pipeline_mode = #tpu.pipeline_mode<synchronous>, transform_indices = @transform_3, window_bounds = array<i64: 1, 512>}, {pipeline_mode = #tpu.pipeline_mode<synchronous>, transform_indices = @transform_4, window_bounds = array<i64: 1, 512>}, {pipeline_mode = #tpu.pipeline_mode<synchronous>, transform_indices = @transform_5, window_bounds = array<i64: 256, 128>}, {pipeline_mode = #tpu.pipeline_mode<synchronous>, transform_indices = @transform_6, window_bounds = array<i64: 1, 128>}, {pipeline_mode = #tpu.pipeline_mode<synchronous>, transform_indices = @transform_7, window_bounds = array<i64: 1, 128>}, {pipeline_mode = #tpu.pipeline_mode<synchronous>, transform_indices = @transform_8, window_bounds = array<i64: 256, 128>}, {pipeline_mode = #tpu.pipeline_mode<synchronous>, transform_indices = @transform_9, window_bounds = array<i64: 1, 128>}, {pipeline_mode = #tpu.pipeline_mode<synchronous>, transform_indices = @transform_10, window_bounds = array<i64: 1, 128>}, {pipeline_mode = #tpu.pipeline_mode<synchronous>, transform_indices = @transform_11, window_bounds = array<i64: 128, 128>}, {pipeline_mode = #tpu.pipeline_mode<synchronous>, transform_indices = @transform_12, window_bounds = array<i64: 128, 128>}, {pipeline_mode = #tpu.pipeline_mode<synchronous>, transform_indices = @transform_13, window_bounds = array<i64: 1, 128>}, {pipeline_mode = #tpu.pipeline_mode<synchronous>, transform_indices = @transform_14, window_bounds = array<i64: 1, 128>}, {pipeline_mode = #tpu.pipeline_mode<synchronous>, transform_indices = @transform_15, window_bounds = array<i64: 1, 1>}, {transform_indices = @transform_16, window_bounds = array<i64: 16, 128>}]} {
    %c0 = arith.constant 0 : index
    %c0_0 = arith.constant 0 : index
    %0 = vector.load %arg1[%c0, %c0_0] : memref<16x16xf32, #tpu.memory_space<vmem>>, vector<16x16xf32>
    %c0_1 = arith.constant 0 : index
    %c0_2 = arith.constant 0 : index
    %1 = vector.load %arg3[%c0_1, %c0_2] : memref<16x512xf32, #tpu.memory_space<vmem>>, vector<16x512xf32>
    %cst = arith.constant dense<0.000000e+00> : vector<16x512xf32>
    %2 = tpu.matmul %0, %1, %cst {dimension_numbers = #tpu.dot_dimension_numbers<[1], [0], [0], [1], [0, 0, 1, 1], [], []>} : vector<16x16xf32>, vector<16x512xf32>, vector<16x512xf32> -> vector<16x512xf32>
    %c0_3 = arith.constant 0 : index
    %c0_4 = arith.constant 0 : index
    %3 = vector.load %arg4[%c0_3, %c0_4] : memref<1x512xf32, #tpu.memory_space<vmem>>, vector<1x512xf32>
    %4 = vector.broadcast %3 : vector<1x512xf32> to vector<16x512xf32>
    %5 = arith.addf %2, %4 : vector<16x512xf32>
    %c0_5 = arith.constant 0 : index
    %c0_6 = arith.constant 0 : index
    %6 = vector.load %arg5[%c0_5, %c0_6] : memref<1x512xf32, #tpu.memory_space<vmem>>, vector<1x512xf32>
    %cst_7 = arith.constant 0.000000e+00 : f32
    %7 = vector.broadcast %cst_7 : f32 to vector<16x512xf32>
    %8 = arith.cmpf ogt, %5, %7 : vector<16x512xf32>
    %9 = vector.broadcast %6 : vector<1x512xf32> to vector<16x512xf32>
    %10 = arith.mulf %9, %5 : vector<16x512xf32>
    %11 = arith.select %8, %5, %10 : vector<16x512xi1>, vector<16x512xf32>
    %12 = vector.extract_strided_slice %11 {offsets = [0, 0], sizes = [16, 256], strides = [1, 1]} : vector<16x512xf32> to vector<16x256xf32>
    %13 = vector.extract_strided_slice %11 {offsets = [0, 256], sizes = [16, 256], strides = [1, 1]} : vector<16x512xf32> to vector<16x256xf32>
    %c0_8 = arith.constant 0 : index
    %c0_9 = arith.constant 0 : index
    %14 = vector.load %arg6[%c0_8, %c0_9] : memref<256x128xf32, #tpu.memory_space<vmem>>, vector<256x128xf32>
    %cst_10 = arith.constant dense<0.000000e+00> : vector<16x128xf32>
    %15 = tpu.matmul %12, %14, %cst_10 {dimension_numbers = #tpu.dot_dimension_numbers<[1], [0], [0], [1], [0, 0, 1, 1], [], []>} : vector<16x256xf32>, vector<256x128xf32>, vector<16x128xf32> -> vector<16x128xf32>
    %c0_11 = arith.constant 0 : index
    %c0_12 = arith.constant 0 : index
    %16 = vector.load %arg7[%c0_11, %c0_12] : memref<1x128xf32, #tpu.memory_space<vmem>>, vector<1x128xf32>
    %17 = vector.broadcast %16 : vector<1x128xf32> to vector<16x128xf32>
    %18 = arith.addf %15, %17 : vector<16x128xf32>
    %c0_13 = arith.constant 0 : index
    %c0_14 = arith.constant 0 : index
    %19 = vector.load %arg8[%c0_13, %c0_14] : memref<1x128xf32, #tpu.memory_space<vmem>>, vector<1x128xf32>
    %cst_15 = arith.constant 0.000000e+00 : f32
    %20 = vector.broadcast %cst_15 : f32 to vector<16x128xf32>
    %21 = arith.cmpf ogt, %18, %20 : vector<16x128xf32>
    %22 = vector.broadcast %19 : vector<1x128xf32> to vector<16x128xf32>
    %23 = arith.mulf %22, %18 : vector<16x128xf32>
    %24 = arith.select %21, %18, %23 : vector<16x128xi1>, vector<16x128xf32>
    %c0_16 = arith.constant 0 : index
    %c0_17 = arith.constant 0 : index
    %25 = vector.load %arg9[%c0_16, %c0_17] : memref<256x128xf32, #tpu.memory_space<vmem>>, vector<256x128xf32>
    %cst_18 = arith.constant dense<0.000000e+00> : vector<16x128xf32>
    %26 = tpu.matmul %13, %25, %cst_18 {dimension_numbers = #tpu.dot_dimension_numbers<[1], [0], [0], [1], [0, 0, 1, 1], [], []>} : vector<16x256xf32>, vector<256x128xf32>, vector<16x128xf32> -> vector<16x128xf32>
    %c0_19 = arith.constant 0 : index
    %c0_20 = arith.constant 0 : index
    %27 = vector.load %arg10[%c0_19, %c0_20] : memref<1x128xf32, #tpu.memory_space<vmem>>, vector<1x128xf32>
    %28 = vector.broadcast %27 : vector<1x128xf32> to vector<16x128xf32>
    %29 = arith.addf %26, %28 : vector<16x128xf32>
    %c0_21 = arith.constant 0 : index
    %c0_22 = arith.constant 0 : index
    %30 = vector.load %arg11[%c0_21, %c0_22] : memref<1x128xf32, #tpu.memory_space<vmem>>, vector<1x128xf32>
    %cst_23 = arith.constant 0.000000e+00 : f32
    %31 = vector.broadcast %cst_23 : f32 to vector<16x128xf32>
    %32 = arith.cmpf ogt, %29, %31 : vector<16x128xf32>
    %33 = vector.broadcast %30 : vector<1x128xf32> to vector<16x128xf32>
    %34 = arith.mulf %33, %29 : vector<16x128xf32>
    %35 = arith.select %32, %29, %34 : vector<16x128xi1>, vector<16x128xf32>
    %c0_24 = arith.constant 0 : index
    %c0_25 = arith.constant 0 : index
    %36 = vector.load %arg12[%c0_24, %c0_25] : memref<128x128xf32, #tpu.memory_space<vmem>>, vector<128x128xf32>
    %cst_26 = arith.constant dense<0.000000e+00> : vector<16x128xf32>
    %37 = tpu.matmul %24, %36, %cst_26 {dimension_numbers = #tpu.dot_dimension_numbers<[1], [0], [0], [1], [0, 0, 1, 1], [], []>} : vector<16x128xf32>, vector<128x128xf32>, vector<16x128xf32> -> vector<16x128xf32>
    %c0_27 = arith.constant 0 : index
    %c0_28 = arith.constant 0 : index
    %38 = vector.load %arg13[%c0_27, %c0_28] : memref<128x128xf32, #tpu.memory_space<vmem>>, vector<128x128xf32>
    %cst_29 = arith.constant dense<0.000000e+00> : vector<16x128xf32>
    %39 = tpu.matmul %35, %38, %cst_29 {dimension_numbers = #tpu.dot_dimension_numbers<[1], [0], [0], [1], [0, 0, 1, 1], [], []>} : vector<16x128xf32>, vector<128x128xf32>, vector<16x128xf32> -> vector<16x128xf32>
    %40 = arith.addf %37, %39 : vector<16x128xf32>
    %c0_30 = arith.constant 0 : index
    %c0_31 = arith.constant 0 : index
    %41 = vector.load %arg14[%c0_30, %c0_31] : memref<1x128xf32, #tpu.memory_space<vmem>>, vector<1x128xf32>
    %42 = vector.broadcast %41 : vector<1x128xf32> to vector<16x128xf32>
    %43 = arith.addf %40, %42 : vector<16x128xf32>
    %44 = tpu.iota {dimensions = array<i32: 1>} : vector<16x128xi32>
    %c4_i32 = arith.constant 4 : i32
    %45 = vector.broadcast %c4_i32 : i32 to vector<16x128xi32>
    %46 = arith.cmpi slt, %44, %45 : vector<16x128xi32>
    %c4_i32_32 = arith.constant 4 : i32
    %47 = vector.broadcast %c4_i32_32 : i32 to vector<16x128xi32>
    %48 = arith.cmpi eq, %44, %47 : vector<16x128xi32>
    %c5_i32 = arith.constant 5 : i32
    %49 = vector.broadcast %c5_i32 : i32 to vector<16x128xi32>
    %50 = arith.cmpi eq, %44, %49 : vector<16x128xi32>
    %51 = math.tanh %43 : vector<16x128xf32>
    %cst_33 = arith.constant 0.000000e+00 : f32
    %52 = vector.broadcast %cst_33 : f32 to vector<16x128xf32>
    %53 = arith.select %46, %51, %52 : vector<16x128xi1>, vector<16x128xf32>
    %c0_34 = arith.constant 0 : index
    %c0_35 = arith.constant 0 : index
    %54 = vector.load %arg2[%c0_34, %c0_35] : memref<16x128xf32, #tpu.memory_space<vmem>>, vector<16x128xf32>
    %55 = arith.subf %54, %53 : vector<16x128xf32>
    %56 = arith.mulf %55, %55 : vector<16x128xf32>
    %c0_36 = arith.constant 0 : index
    %c0_37 = arith.constant 0 : index
    %57 = vector.load %arg15[%c0_36, %c0_37] : memref<1x128xf32, #tpu.memory_space<vmem>>, vector<1x128xf32>
    %58 = vector.broadcast %57 : vector<1x128xf32> to vector<16x128xf32>
    %59 = arith.mulf %56, %58 : vector<16x128xf32>
    %cst_38 = arith.constant dense<0.000000e+00> : vector<16xf32>
    %60 = vector.multi_reduction <add>, %59, %cst_38 [1] : vector<16x128xf32> to vector<16xf32>
    %61 = vector.shape_cast %60 : vector<16xf32> to vector<16x1xf32>
    %c0_39 = arith.constant 0 : index
    %c0_40 = arith.constant 0 : index
    %62 = vector.load %arg16[%c0_39, %c0_40] : memref<1x1xf32, #tpu.memory_space<vmem>>, vector<1x1xf32>
    %63 = vector.extract %62[0, 0] : f32 from vector<1x1xf32>
    %cst_41 = arith.constant 5.000000e-01 : f32
    %64 = vector.broadcast %cst_41 : f32 to vector<16x1xf32>
    %65 = arith.mulf %64, %61 : vector<16x1xf32>
    %66 = vector.broadcast %63 : f32 to vector<16x1xf32>
    %67 = arith.subf %66, %65 : vector<16x1xf32>
    %cst_42 = arith.constant 0.000000e+00 : f32
    %68 = vector.broadcast %cst_42 : f32 to vector<16x128xf32>
    %69 = arith.select %48, %43, %68 : vector<16x128xi1>, vector<16x128xf32>
    %70 = arith.addf %53, %69 : vector<16x128xf32>
    %cst_43 = arith.constant 0.000000e+00 : f32
    %71 = vector.shape_cast %67 : vector<16x1xf32> to vector<16x1xf32>
    %72 = vector.broadcast %71 : vector<16x1xf32> to vector<16x128xf32>
    %73 = vector.broadcast %cst_43 : f32 to vector<16x128xf32>
    %74 = arith.select %50, %72, %73 : vector<16x128xi1>, vector<16x128xf32>
    %75 = arith.addf %70, %74 : vector<16x128xf32>
    %c0_44 = arith.constant 0 : index
    %c0_45 = arith.constant 0 : index
    %76 = vector.load %arg17[%c0_44, %c0_45] : memref<16x128xf32, #tpu.memory_space<vmem>>, vector<16x128xf32>
    tpu.vector_store %arg17[%c0_44, %c0_45], %75 {strides = array<i32>} : memref<16x128xf32, #tpu.memory_space<vmem>>, vector<16x128xf32>,
    return
  }
  func.func @transform_0(%arg0: i32) -> (i32, i32) {
    %c0_i32 = arith.constant 0 : i32
    %c0_i32_0 = arith.constant 0 : i32
    return %arg0, %c0_i32 : i32, i32
  }
  func.func @transform_1(%arg0: i32) -> (i32, i32) {
    %c0_i32 = arith.constant 0 : i32
    %c0_i32_0 = arith.constant 0 : i32
    return %arg0, %c0_i32 : i32, i32
  }
  func.func @transform_2(%arg0: i32) -> (i32, i32) {
    %c0_i32 = arith.constant 0 : i32
    %c0_i32_0 = arith.constant 0 : i32
    %c0_i32_1 = arith.constant 0 : i32
    return %c0_i32, %c0_i32_0 : i32, i32
  }
  func.func @transform_3(%arg0: i32) -> (i32, i32) {
    %c0_i32 = arith.constant 0 : i32
    %c0_i32_0 = arith.constant 0 : i32
    %c0_i32_1 = arith.constant 0 : i32
    return %c0_i32, %c0_i32_0 : i32, i32
  }
  func.func @transform_4(%arg0: i32) -> (i32, i32) {
    %c0_i32 = arith.constant 0 : i32
    %c0_i32_0 = arith.constant 0 : i32
    %c0_i32_1 = arith.constant 0 : i32
    return %c0_i32, %c0_i32_0 : i32, i32
  }
  func.func @transform_5(%arg0: i32) -> (i32, i32) {
    %c0_i32 = arith.constant 0 : i32
    %c0_i32_0 = arith.constant 0 : i32
    %c0_i32_1 = arith.constant 0 : i32
    return %c0_i32, %c0_i32_0 : i32, i32
  }
  func.func @transform_6(%arg0: i32) -> (i32, i32) {
    %c0_i32 = arith.constant 0 : i32
    %c0_i32_0 = arith.constant 0 : i32
    %c0_i32_1 = arith.constant 0 : i32
    return %c0_i32, %c0_i32_0 : i32, i32
  }
  func.func @transform_7(%arg0: i32) -> (i32, i32) {
    %c0_i32 = arith.constant 0 : i32
    %c0_i32_0 = arith.constant 0 : i32
    %c0_i32_1 = arith.constant 0 : i32
    return %c0_i32, %c0_i32_0 : i32, i32
  }
  func.func @transform_8(%arg0: i32) -> (i32, i32) {
    %c0_i32 = arith.constant 0 : i32
    %c0_i32_0 = arith.constant 0 : i32
    %c0_i32_1 = arith.constant 0 : i32
    return %c0_i32, %c0_i32_0 : i32, i32
  }
  func.func @transform_9(%arg0: i32) -> (i32, i32) {
    %c0_i32 = arith.constant 0 : i32
    %c0_i32_0 = arith.constant 0 : i32
    %c0_i32_1 = arith.constant 0 : i32
    return %c0_i32, %c0_i32_0 : i32, i32
  }
  func.func @transform_10(%arg0: i32) -> (i32, i32) {
    %c0_i32 = arith.constant 0 : i32
    %c0_i32_0 = arith.constant 0 : i32
    %c0_i32_1 = arith.constant 0 : i32
    return %c0_i32, %c0_i32_0 : i32, i32
  }
  func.func @transform_11(%arg0: i32) -> (i32, i32) {
    %c0_i32 = arith.constant 0 : i32
    %c0_i32_0 = arith.constant 0 : i32
    %c0_i32_1 = arith.constant 0 : i32
    return %c0_i32, %c0_i32_0 : i32, i32
  }
  func.func @transform_12(%arg0: i32) -> (i32, i32) {
    %c0_i32 = arith.constant 0 : i32
    %c0_i32_0 = arith.constant 0 : i32
    %c0_i32_1 = arith.constant 0 : i32
    return %c0_i32, %c0_i32_0 : i32, i32
  }
  func.func @transform_13(%arg0: i32) -> (i32, i32) {
    %c0_i32 = arith.constant 0 : i32
    %c0_i32_0 = arith.constant 0 : i32
    %c0_i32_1 = arith.constant 0 : i32
    return %c0_i32, %c0_i32_0 : i32, i32
  }
  func.func @transform_14(%arg0: i32) -> (i32, i32) {
    %c0_i32 = arith.constant 0 : i32
    %c0_i32_0 = arith.constant 0 : i32
    %c0_i32_1 = arith.constant 0 : i32
    return %c0_i32, %c0_i32_0 : i32, i32
  }
  func.func @transform_15(%arg0: i32) -> (i32, i32) {
    %c0_i32 = arith.constant 0 : i32
    %c0_i32_0 = arith.constant 0 : i32
    %c0_i32_1 = arith.constant 0 : i32
    return %c0_i32, %c0_i32_0 : i32, i32
  }
  func.func @transform_16(%arg0: i32) -> (i32, i32) {
    %c0_i32 = arith.constant 0 : i32
    %c0_i32_0 = arith.constant 0 : i32
    return %arg0, %c0_i32 : i32, i32
  }
}

</mosaic_0001>

<bundles_post_ra>
// kernel: tpu_custom_call.1
= control target key start
LH: loop header
LB: loop body
LE: loop exit
PB: predicated region body
PF: predicated region fallthrough
CT: control target
= control target key end

     0   :  { %s1152_s0 = inlined_call_operand.hbm [shape: f32[16,16], index: 0, kind: input, shape index: {}]   ;;  %s1153_s1 = inlined_call_operand.hbm [shape: f32[16,128], index: 1, kind: input, shape index: {}]   ;;  %s1154_s2 = inlined_call_operand.hbm [shape: f32[16,512], index: 2, kind: input, shape index: {}]   ;;  %s1155_s3 = inlined_call_operand.vmem [shape: f32[1,512], index: 3, kind: input, shape index: {}]   ;;  %s1156_s4 = inlined_call_operand.hbm [shape: f32[1,512], index: 4, kind: input, shape index: {}]   ;;  %s1157_s5 = inlined_call_operand.hbm [shape: f32[256,128], index: 5, kind: input, shape index: {}]   ;;  %s1158_s6 = inlined_call_operand.vmem [shape: f32[1,128], index: 6, kind: input, shape index: {}]   ;;  %s1159_s7 = inlined_call_operand.vmem [shape: f32[1,128], index: 7, kind: input, shape index: {}]   ;;  %s1160_s8 = inlined_call_operand.hbm [shape: f32[256,128], index: 8, kind: input, shape index: {}]   ;;  %s1161_s9 = inlined_call_operand.vmem [shape: f32[1,128], index: 9, kind: input, shape index: {}]   ;;  %s1162_s10 = inlined_call_operand.vmem [shape: f32[1,128], index: 10, kind: input, shape index: {}]   ;;  %s1163_s11 = inlined_call_operand.hbm [shape: f32[128,128], index: 11, kind: input, shape index: {}]   ;;  %s1164_s12 = inlined_call_operand.hbm [shape: f32[128,128], index: 12, kind: input, shape index: {}]   ;;  %s1165_s13 = inlined_call_operand.vmem [shape: f32[1,128], index: 13, kind: input, shape index: {}]   ;;  %s1166_s14 = inlined_call_operand.vmem [shape: f32[1,128], index: 14, kind: input, shape index: {}]   ;;  %s1167_s15 = inlined_call_operand.<no memory space> [shape: f32[1,1], index: 15, kind: input, shape index: {}]   ;;  %s1168_s16 = inlined_call_operand.hbm [shape: f32[16,128], index: 16, kind: output, shape index: {}]  }
   0x1   :  { %1169 = sst [smem:[#allocation24_spill]] %s1152_s0  ;;  %v21_v0 = vstv %s1167_s15 }
   0x2   :  { %22 = vst [vmem:[#allocation2] sm:$0x1] %v21_v0 }
   0x3   :  { %23 = vsyncpa [#allocation4], 0 }
   0x4   :  { %24 = vsyncpa [#allocation7], 0 }
   0x5   :  { %25 = vsyncpa [#allocation10], 0 }
   0x6   :  { %26 = vsyncpa [#allocation13], 0 }
   0x7   :  { %27 = vsyncpa [#allocation16], 0 }
   0x8   :  { %28 = vsyncpa [#allocation5], 0  ;;  %s46_s25 = sshll.u32 %s1153_s1, 4  ;;  %s958_s26 = smov [#allocation6]   ;;  %s47_s25 = int_to_ptr.hbm [resolvable:$true] %s46_s25 }
   0x9   :  { %s48_s27 = sshll.u32 %s958_s26, 4  ;;  %s75_s30 = sshll.u32 %s1156_s4, 4  ;;  %s49_s27 = int_to_ptr.vmem [resolvable:$true] %s48_s27  ;;  %s76_s30 = int_to_ptr.hbm [resolvable:$true] %s75_s30 }
   0xa   :  { %s959_s15 = smov 128   ;;  %s960_s0 = smov 8  }
   0xb   :  { %54 = dma.hbm_to_vmem [thread:$0]  %s47_s25, 256, %s49_s27, [#allocation7], %s959_s15, %s959_s15, %s960_s0  }
   0xc   :  { %s961_s17 = smov [#allocation9]   ;;  %s102_s1 = sshll.u32 %s1160_s8, 4  ;;  %s103_s1 = int_to_ptr.hbm [resolvable:$true] %s102_s1 }
   0xd   :  { %s77_s18 = sshll.u32 %s961_s17, 4  ;;  %s1170_s23 = sld [smem:[#allocation24_spill]]  ;;  %s78_s18 = int_to_ptr.vmem [resolvable:$true] %s77_s18 }
   0xe   :  { %80 = dma.hbm_to_vmem [thread:$0]  %s76_s30, 64, %s78_s18, [#allocation10]  }
   0xf   :  { %s962_s24 = smov [#allocation12]   ;;  %s963_s25 = smov [#allocation3]  }
  0x10   :  { %s104_s26 = sshll.u32 %s962_s24, 4  ;;  %s35_s27 = sshll.u32 %s963_s25, 4  ;;  %s105_s26 = int_to_ptr.vmem [resolvable:$true] %s104_s26  ;;  %s36_s27 = int_to_ptr.vmem [resolvable:$true] %s35_s27 }
  0x11   :  { %110 = dma.hbm_to_vmem [thread:$0]  %s103_s1, 4096, %s105_s26, [#allocation13], %s959_s15, %s959_s15, %s960_s0  }
  0x12   :  { %s59_s8 = sshll.u32 %s1154_s2, 4  ;;  %s964_s30 = smov [#allocation8]   ;;  %s60_s8 = int_to_ptr.hbm [resolvable:$true] %s59_s8 }
  0x13   :  { %s33_s4 = sshll.u32 %s1170_s23, 4  ;;  %s61_s17 = sshll.u32 %s964_s30, 4  ;;  %s34_s4 = int_to_ptr.hbm [resolvable:$true] %s33_s4  ;;  %s62_s17 = int_to_ptr.vmem [resolvable:$true] %s61_s17 }
  0x14   :  { %41 = dma.hbm_to_vmem [thread:$0]  %s34_s4, 256, %s36_s27, [#allocation4], %s959_s15, %s959_s15, %s960_s0  }
  0x15   :  { %s85_s20 = sshll.u32 %s1157_s5, 4  ;;  %s965_s1 = smov 512   ;;  %s86_s20 = int_to_ptr.hbm [resolvable:$true] %s85_s20 }
  0x16   :  { %s966_s21 = smov 32   ;;  %s967_s22 = smov [#allocation11]  }
  0x17   :  { %67 = dma.hbm_to_vmem [thread:$0]  %s60_s8, 1024, %s62_s17, [#allocation7], %s965_s1, %s965_s1, %s966_s21  }
  0x18   :  { %s87_s23 = sshll.u32 %s967_s22, 4  ;;  %s119_s26 = sshll.u32 %s1163_s11, 4  ;;  %s88_s23 = int_to_ptr.vmem [resolvable:$true] %s87_s23  ;;  %s120_s26 = int_to_ptr.hbm [resolvable:$true] %s119_s26 }
  0x19   :  { %93 = dma.hbm_to_vmem [thread:$0]  %s86_s20, 4096, %s88_s23, [#allocation10], %s959_s15, %s959_s15, %s960_s0  }
  0x1a   :  { %s132_s5 = sshll.u32 %s1164_s12, 4  ;;  %s968_s27 = smov [#allocation14]   ;;  %s133_s5 = int_to_ptr.hbm [resolvable:$true] %s132_s5 }
  0x1b   :  { %s121_s28 = sshll.u32 %s968_s27, 4  ;;  %s969_s29 = smov [#allocation15]   ;;  %s122_s28 = int_to_ptr.vmem [resolvable:$true] %s121_s28 }
  0x1c   :  { %127 = dma.hbm_to_vmem [thread:$0]  %s120_s26, 2048, %s122_s28, [#allocation13], %s959_s15, %s959_s15, %s960_s0  }
  0x1d   :  { %s134_s11 = sshll.u32 %s969_s29, 4  ;;  %s135_s11 = int_to_ptr.vmem [resolvable:$true] %s134_s11 }
  0x1e   :  { %140 = dma.hbm_to_vmem [thread:$0]  %s133_s5, 2048, %s135_s11, [#allocation16], %s959_s15, %s959_s15, %s960_s0  }
  0x1f   :  { %946 = dma.done.wait [#allocation4], 256  }
  0x20   :  { %947 = vsyncadd [#allocation4], 4294967040 }
  0x21   :  { %948 = dma.done.wait [#allocation7], 1280  }
  0x22   :  { %949 = vsyncadd [#allocation7], 4294966016 }
  0x23   :  { %950 = dma.done.wait [#allocation10], 4160  }
  0x24   :  { %951 = vsyncadd [#allocation10], 4294963136 }
  0x25   :  { %952 = dma.done.wait [#allocation13], 6144  }
  0x26   :  { %953 = vsyncadd [#allocation13], 4294961152 }
  0x27   :  { %954 = dma.done.wait [#allocation16], 2048  }
  0x28   :  { %955 = vsyncadd [#allocation16], 4294965248  ;;  %v187_v1 = vld [vmem:[#allocation8 + $0x30] sm:$0xff]  ;;  %v188_v2 = vld [vmem:[#allocation8 + $0x38] sm:$0xff]  ;;  %vm199_vm0 = vcmask 130048   ;;  %s970_s21 = smov [#allocation17]  }
  0x29   :  { %v183_v3 = vld [vmem:[#allocation8 + $0x10] sm:$0xff]  ;;  %266 = vmatpush.msra.mxu2 %v187_v1  ;;  %289 = vmatpush.msra.mxu3 %v188_v2  ;;  %v184_v4 = vld [vmem:[#allocation8 + $0x18] sm:$0xff]  ;;  %v179_v5 = vld [vmem:[#allocation3] sm:$0xff]  ;;  %s646_s22 = sshll.u32 %s970_s21, 4  ;;  %s648_s24 = sshll.u32 %s1168_s16, 4  ;;  %s647_s22 = int_to_ptr.vmem [resolvable:$true] %s646_s22  ;;  %s649_s24 = int_to_ptr.hbm [resolvable:$true] %s648_s24 }
  0x2a   :  { %v185_v6 = vld [vmem:[#allocation8 + $0x20] sm:$0xff]  ;;  %v186_v8 = vld [vmem:[#allocation8 + $0x28] sm:$0xff]  ;;  %v438_v13 = vld [vmem:[#allocation12 + $0x70] sm:$0xff] }
  0x2b   :  { %220 = vmatpush.msra.mxu0 %v185_v6  ;;  %v181_v7 = vld [vmem:[#allocation8] sm:$0xff]  ;;  %267 = vmatpush.msra.mxu2 %v183_v3  ;;  %v182_v10 = vld [vmem:[#allocation8 + $0x8] sm:$0xff]  ;;  %v454_v14 = vld [vmem:[#allocation12 + $0xf0] sm:$0xff] }
  0x2c   :  { %290 = vmatpush.msra.mxu3 %v184_v4  ;;  %v439_v9 = vld [vmem:[#allocation12 + $0x78] sm:$0xff]  ;;  %669 = vmatmul.msk.f32.vlgmr.msra.gmra.mxu2 %vm199_vm0, %v179_v5  ;;  %v346_v15 = vld [vmem:[#allocation11 + $0x70] sm:$0xff]  ;;  %v437_v17 = vld [vmem:[#allocation12 + $0x68] sm:$0xff] }
  0x2d   :  { %671 = vmatmul.msk.f32.vlgmr.msra.gmra.mxu3 %vm199_vm0, %v179_v5  ;;  %v455_v11 = vld [vmem:[#allocation12 + $0xf8] sm:$0xff]  ;;  %221 = vmatpush.msra.mxu0 %v181_v7  ;;  %v453_v18 = vld [vmem:[#allocation12 + $0xe8] sm:$0xff]  ;;  %v362_v21 = vld [vmem:[#allocation11 + $0xf0] sm:$0xff] }
  0x2e   :  { %243 = vmatpush.msra.mxu1 %v186_v8  ;;  %v347_v12 = vld [vmem:[#allocation11 + $0x78] sm:$0xff]  ;;  %665 = vmatmul.msk.f32.vlgmr.msra.gmra.mxu0 %vm199_vm0, %v179_v5  ;;  %v180_v19 = vld [vmem:[#allocation3 + $0x8] sm:$0xff]  ;;  %v434_v29 = vld [vmem:[#allocation12 + $0x50] sm:$0xff] }
  0x2f   :  { %460 = vmatpush.msrb.mxu2 %v439_v9  ;;  %483 = vmatpush.msrb.mxu3 %v455_v11  ;;  %v363_v16 = vld [vmem:[#allocation11 + $0xf8] sm:$0xff]  ;;  %v345_v20 = vld [vmem:[#allocation11 + $0x68] sm:$0xff]  ;;  %v436_v22 = vld [vmem:[#allocation12 + $0x60] sm:$0xff] }
  0x30   :  { %244 = vmatpush.msra.mxu1 %v182_v10  ;;  %368 = vmatpush.msrb.mxu0 %v347_v12  ;;  %v452_v23 = vld [vmem:[#allocation12 + $0xe0] sm:$0xff]  ;;  %v435_v25 = vld [vmem:[#allocation12 + $0x58] sm:$0xff]  ;;  %v361_v26 = vld [vmem:[#allocation11 + $0xe8] sm:$0xff] }
  0x31   :  { %667 = vmatmul.msk.f32.vlgmr.msra.gmra.mxu1 %vm199_vm0, %v179_v5  ;;  %461 = vmatpush.msrb.mxu2 %v438_v13  ;;  %v344_v24 = vld [vmem:[#allocation11 + $0x60] sm:$0xff]  ;;  %v451_v27 = vld [vmem:[#allocation12 + $0xd8] sm:$0xff]  ;;  %v450_v31 = vld [vmem:[#allocation12 + $0xd0] sm:$0xff] }
  0x32   :  { %484 = vmatpush.msrb.mxu3 %v454_v14  ;;  %369 = vmatpush.msrb.mxu0 %v346_v15  ;;  %v343_v28 = vld [vmem:[#allocation11 + $0x58] sm:$0xff]  ;;  %v360_v30 = vld [vmem:[#allocation11 + $0xe0] sm:$0xff]  ;;  %v342_v32 = vld [vmem:[#allocation11 + $0x50] sm:$0xff] }
  0x33   :  { %391 = vmatpush.msrb.mxu1 %v363_v16  ;;  %462 = vmatpush.msrb.mxu2 %v437_v17  ;;  %v359_v33 = vld [vmem:[#allocation11 + $0xd8] sm:$0xff]  ;;  %v433_v34 = vld [vmem:[#allocation12 + $0x48] sm:$0xff]  ;;  %v358_v37 = vld [vmem:[#allocation11 + $0xd0] sm:$0xff] }
  0x34   :  { %485 = vmatpush.msrb.mxu3 %v453_v18  ;;  %670 = vmatmul.msk.f32.gmra.mxu2 %vm199_vm0, %v180_v19  ;;  %v449_v35 = vld [vmem:[#allocation12 + $0xc8] sm:$0xff]  ;;  %v432_v38 = vld [vmem:[#allocation12 + $0x40] sm:$0xff]  ;;  %v431_v41 = vld [vmem:[#allocation12 + $0x38] sm:$0xff] }
  0x35   :  { %672 = vmatmul.msk.f32.gmra.mxu3 %vm199_vm0, %v180_v19  ;;  %370 = vmatpush.msrb.mxu0 %v345_v20  ;;  %v341_v36 = vld [vmem:[#allocation11 + $0x48] sm:$0xff]  ;;  %v448_v39 = vld [vmem:[#allocation12 + $0xc0] sm:$0xff]  ;;  %v447_v43 = vld [vmem:[#allocation12 + $0xb8] sm:$0xff] }
  0x36   :  { %392 = vmatpush.msrb.mxu1 %v362_v21  ;;  %666 = vmatmul.msk.f32.gmra.mxu0 %vm199_vm0, %v180_v19  ;;  %v340_v40 = vld [vmem:[#allocation11 + $0x40] sm:$0xff]  ;;  %v357_v42 = vld [vmem:[#allocation11 + $0xc8] sm:$0xff]  ;;  %v339_v44 = vld [vmem:[#allocation11 + $0x38] sm:$0xff] }
  0x37   :  { %463 = vmatpush.msrb.mxu2 %v436_v22  ;;  %486 = vmatpush.msrb.mxu3 %v452_v23  ;;  %v430_v45 = vld [vmem:[#allocation12 + $0x30] sm:$0xff]  ;;  %v356_v46 = vld [vmem:[#allocation11 + $0xc0] sm:$0xff]  ;;  %v429_v49 = vld [vmem:[#allocation12 + $0x28] sm:$0xff] }
  0x38   :  { %371 = vmatpush.msrb.mxu0 %v344_v24  ;;  %393 = vmatpush.msrb.mxu1 %v361_v26  ;;  %v446_v47 = vld [vmem:[#allocation12 + $0xb0] sm:$0xff]  ;;  %v355_v50 = vld [vmem:[#allocation11 + $0xb8] sm:$0xff]  ;;  %v445_v51 = vld [vmem:[#allocation12 + $0xa8] sm:$0xff] }
  0x39   :  { %668 = vmatmul.msk.f32.gmra.mxu1 %vm199_vm0, %v180_v19  ;;  %464 = vmatpush.msrb.mxu2 %v435_v25  ;;  %v338_v48 = vld [vmem:[#allocation11 + $0x30] sm:$0xff]  ;;  %v337_v52 = vld [vmem:[#allocation11 + $0x28] sm:$0xff]  ;;  %v428_v53 = vld [vmem:[#allocation12 + $0x20] sm:$0xff] }
  0x3a   :  { %487 = vmatpush.msrb.mxu3 %v451_v27  ;;  %372 = vmatpush.msrb.mxu0 %v343_v28  ;;  %v354_v54 = vld [vmem:[#allocation11 + $0xb0] sm:$0xff]  ;;  %v444_v55 = vld [vmem:[#allocation12 + $0xa0] sm:$0xff]  ;;  %v427_v57 = vld [vmem:[#allocation12 + $0x18] sm:$0xff] }
  0x3b   :  { %465 = vmatpush.msrb.mxu2 %v434_v29  ;;  %394 = vmatpush.msrb.mxu1 %v360_v30  ;;  %v336_v56 = vld [vmem:[#allocation11 + $0x20] sm:$0xff]  ;;  %v353_v58 = vld [vmem:[#allocation11 + $0xa8] sm:$0xff]  ;;  %v443_v59 = vld [vmem:[#allocation12 + $0x98] sm:$0xff] }
  0x3c   :  { %488 = vmatpush.msrb.mxu3 %v450_v31  ;;  %373 = vmatpush.msrb.mxu0 %v342_v32  ;;  %v335_v60 = vld [vmem:[#allocation11 + $0x18] sm:$0xff]  ;;  %v352_v61 = vld [vmem:[#allocation11 + $0xa0] sm:$0xff]  ;;  %v426_v62 = vld [vmem:[#allocation12 + $0x10] sm:$0xff] }
  0x3d   :  { %466 = vmatpush.msrb.mxu2 %v433_v34  ;;  %395 = vmatpush.msrb.mxu1 %v359_v33  ;;  %v442_v63 = vld [vmem:[#allocation12 + $0x90] sm:$0xff]  ;;  %v351_v1 = vld [vmem:[#allocation11 + $0x98] sm:$0xff]  ;;  %v425_v2 = vld [vmem:[#allocation12 + $0x8] sm:$0xff] }
  0x3e   :  { %489 = vmatpush.msrb.mxu3 %v449_v35  ;;  %374 = vmatpush.msrb.mxu0 %v341_v36  ;;  %v334_v0 = vld [vmem:[#allocation11 + $0x10] sm:$0xff]  ;;  %v441_v3 = vld [vmem:[#allocation12 + $0x88] sm:$0xff]  ;;  %v424_v6 = vld [vmem:[#allocation12] sm:$0xff] }
  0x3f   :  { %467 = vmatpush.msrb.mxu2 %v432_v38  ;;  %396 = vmatpush.msrb.mxu1 %v358_v37  ;;  %v333_v4 = vld [vmem:[#allocation11 + $0x8] sm:$0xff]  ;;  %v350_v5 = vld [vmem:[#allocation11 + $0x90] sm:$0xff]  ;;  %v440_v7 = vld [vmem:[#allocation12 + $0x80] sm:$0xff] }
  0x40   :  { %490 = vmatpush.msrb.mxu3 %v448_v39  ;;  %375 = vmatpush.msrb.mxu0 %v340_v40  ;;  %v332_v8 = vld [vmem:[#allocation11] sm:$0xff]  ;;  %v349_v9 = vld [vmem:[#allocation11 + $0x88] sm:$0xff]  ;;  %v531_v11 = vld [vmem:[#allocation14 + $0x78] sm:$0xff] }
  0x41   :  { %468 = vmatpush.msrb.mxu2 %v431_v41  ;;  %397 = vmatpush.msrb.mxu1 %v357_v42  ;;  %v348_v10 = vld [vmem:[#allocation11 + $0x80] sm:$0xff]  ;;  %v530_v12 = vld [vmem:[#allocation14 + $0x70] sm:$0xff]  ;;  %v547_v13 = vld [vmem:[#allocation15 + $0x78] sm:$0xff] }
  0x42   :  { %491 = vmatpush.msrb.mxu3 %v447_v43  ;;  %376 = vmatpush.msrb.mxu0 %v339_v44  ;;  %v546_v14 = vld [vmem:[#allocation15 + $0x70] sm:$0xff]  ;;  %v529_v15 = vld [vmem:[#allocation14 + $0x68] sm:$0xff]  ;;  %v528_v17 = vld [vmem:[#allocation14 + $0x60] sm:$0xff] }
  0x43   :  { %469 = vmatpush.msrb.mxu2 %v430_v45  ;;  %398 = vmatpush.msrb.mxu1 %v356_v46  ;;  %v545_v16 = vld [vmem:[#allocation15 + $0x68] sm:$0xff]  ;;  %v544_v18 = vld [vmem:[#allocation15 + $0x60] sm:$0xff]  ;;  %v527_v19 = vld [vmem:[#allocation14 + $0x58] sm:$0xff] }
  0x44   :  { %492 = vmatpush.msrb.mxu3 %v446_v47  ;;  %377 = vmatpush.msrb.mxu0 %v338_v48  ;;  %v543_v20 = vld [vmem:[#allocation15 + $0x58] sm:$0xff]  ;;  %v526_v21 = vld [vmem:[#allocation14 + $0x50] sm:$0xff]  ;;  %v525_v24 = vld [vmem:[#allocation14 + $0x48] sm:$0xff] }
  0x45   :  { %470 = vmatpush.msrb.mxu2 %v429_v49  ;;  %399 = vmatpush.msrb.mxu1 %v355_v50  ;;  %v542_v22 = vld [vmem:[#allocation15 + $0x50] sm:$0xff]  ;;  %v1112_v23 = vld [vmem:[%s1155_s3] sm:$0xf]  ;;  %v541_v25 = vld [vmem:[#allocation15 + $0x48] sm:$0xff] }
  0x46   :  { %493 = vmatpush.msrb.mxu3 %v445_v51  ;;  %378 = vmatpush.msrb.mxu0 %v337_v52  ;;  %v191_v26 = vperm.slane %v1112_v23, 0  ;;  %v1115_v27 = vld [vmem:[#allocation9] sm:$0xf]  ;;  %v524_v28 = vld [vmem:[#allocation14 + $0x40] sm:$0xff]  ;;  %v192_v31 = vperm.slane %v1112_v23, 1  ;;  %v193_v35 = vperm.slane %v1112_v23, 2 }
  0x47   :  { %471 = vmatpush.msrb.mxu2 %v428_v53  ;;  %400 = vmatpush.msrb.mxu1 %v354_v54  ;;  %v540_v29 = vld [vmem:[#allocation15 + $0x40] sm:$0xff]  ;;  %v308_v30 = vperm.slane %v1115_v27, 0  ;;  %v523_v33 = vld [vmem:[#allocation14 + $0x38] sm:$0xff]  ;;  %v194_v36 = vperm.slane %v1112_v23, 3  ;;  %v309_v38 = vperm.slane %v1115_v27, 1  ;;  %v310_v39 = vperm.slane %v1115_v27, 2 }
  0x48   :  { %494 = vmatpush.msrb.mxu3 %v444_v55  ;;  %379 = vmatpush.msrb.mxu0 %v336_v56  ;;  %v539_v34 = vld [vmem:[#allocation15 + $0x38] sm:$0xff]  ;;  %v522_v41 = vld [vmem:[#allocation14 + $0x30] sm:$0xff]  ;;  %v311_v42 = vperm.slane %v1115_v27, 3  ;;  %v521_v47 = vld [vmem:[#allocation14 + $0x28] sm:$0xff] }
  0x49   :  { %472 = vmatpush.msrb.mxu2 %v427_v57  ;;  %401 = vmatpush.msrb.mxu1 %v353_v58  ;;  %v538_v48 = vld [vmem:[#allocation15 + $0x30] sm:$0xff]  ;;  %v520_v57 = vld [vmem:[#allocation14 + $0x20] sm:$0xff] }
  0x4a   :  { %495 = vmatpush.msrb.mxu3 %v443_v59  ;;  %380 = vmatpush.msrb.mxu0 %v335_v60 }
  0x4b   :  { %402 = vmatpush.msrb.mxu1 %v352_v61  ;;  %473 = vmatpush.msrb.mxu2 %v426_v62 }
  0x4c   :  { %496 = vmatpush.msrb.mxu3 %v442_v63  ;;  %381 = vmatpush.msrb.mxu0 %v334_v0 }
  0x4d   :  { %403 = vmatpush.msrb.mxu1 %v351_v1  ;;  %474 = vmatpush.msrb.mxu2 %v425_v2 }
  0x4e   :  { %497 = vmatpush.msrb.mxu3 %v441_v3  ;;  %382 = vmatpush.msrb.mxu0 %v333_v4 }
  0x4f   :  { %404 = vmatpush.msrb.mxu1 %v350_v5  ;;  %475 = vmatpush.msrb.mxu2 %v424_v6 }
  0x50   :  { %498 = vmatpush.msrb.mxu3 %v440_v7  ;;  %383 = vmatpush.msrb.mxu0 %v332_v8 }
  0x51   :  { %405 = vmatpush.msrb.mxu1 %v349_v9  ;;  %673 = vmatpush.msra.mxu2 %v547_v13 }
  0x52   :  { %548 = vmatpush.msra.mxu0 %v547_v13  ;;  %689 = vmatpush.msra.mxu3 %v531_v11  ;;  %v536_v13 = vld [vmem:[#allocation15 + $0x20] sm:$0xff] }
  0x53   :  { %406 = vmatpush.msrb.mxu1 %v348_v10  ;;  %674 = vmatpush.msra.mxu2 %v546_v14 }
  0x54   :  { %549 = vmatpush.msra.mxu0 %v546_v14  ;;  %690 = vmatpush.msra.mxu3 %v530_v12  ;;  %v518_v14 = vld [vmem:[#allocation14 + $0x10] sm:$0xff] }
  0x55   :  { %571 = vmatpush.msra.mxu1 %v531_v11  ;;  %675 = vmatpush.msra.mxu2 %v545_v16  ;;  %v537_v11 = vld [vmem:[#allocation15 + $0x28] sm:$0xff] }
  0x56   :  { %550 = vmatpush.msra.mxu0 %v545_v16  ;;  %691 = vmatpush.msra.mxu3 %v529_v15  ;;  %v517_v16 = vld [vmem:[#allocation14 + $0x8] sm:$0xff] }
  0x57   :  { %572 = vmatpush.msra.mxu1 %v530_v12  ;;  %676 = vmatpush.msra.mxu2 %v544_v18  ;;  %v519_v12 = vld [vmem:[#allocation14 + $0x18] sm:$0xff] }
  0x58   :  { %551 = vmatpush.msra.mxu0 %v544_v18  ;;  %692 = vmatpush.msra.mxu3 %v528_v17  ;;  %v516_v18 = vld [vmem:[#allocation14] sm:$0xff] }
  0x59   :  { %573 = vmatpush.msra.mxu1 %v529_v15  ;;  %677 = vmatpush.msra.mxu2 %v543_v20  ;;  %v535_v15 = vld [vmem:[#allocation15 + $0x18] sm:$0xff] }
  0x5a   :  { %552 = vmatpush.msra.mxu0 %v543_v20  ;;  %693 = vmatpush.msra.mxu3 %v527_v19  ;;  %v532_v20 = vld [vmem:[#allocation15] sm:$0xff] }
  0x5b   :  { %574 = vmatpush.msra.mxu1 %v528_v17  ;;  %678 = vmatpush.msra.mxu2 %v542_v22  ;;  %v534_v17 = vld [vmem:[#allocation15 + $0x10] sm:$0xff] }
  0x5c   :  { %553 = vmatpush.msra.mxu0 %v542_v22  ;;  %694 = vmatpush.msra.mxu3 %v526_v21 }
  0x5d   :  { %575 = vmatpush.msra.mxu1 %v527_v19  ;;  %679 = vmatpush.msra.mxu2 %v541_v25  ;;  %v533_v19 = vld [vmem:[#allocation15 + $0x8] sm:$0xff] }
  0x5e   :  { %554 = vmatpush.msra.mxu0 %v541_v25  ;;  %695 = vmatpush.msra.mxu3 %v525_v24 }
  0x5f   :  { %576 = vmatpush.msra.mxu1 %v526_v21  ;;  %680 = vmatpush.msra.mxu2 %v540_v29  ;;  %v720_v21 = vld [vmem:[%s1158_s6] ss:$0 sm:$0xff] }
  0x60   :  { %555 = vmatpush.msra.mxu0 %v540_v29  ;;  %696 = vmatpush.msra.mxu3 %v524_v28 }
  0x61   :  { %577 = vmatpush.msra.mxu1 %v525_v24  ;;  %681 = vmatpush.msra.mxu2 %v539_v34  ;;  %v721_v24 = vld [vmem:[%s1159_s7] ss:$0 sm:$0xff] }
  0x62   :  { %556 = vmatpush.msra.mxu0 %v539_v34  ;;  %697 = vmatpush.msra.mxu3 %v523_v33 }
  0x63   :  { %578 = vmatpush.msra.mxu1 %v524_v28  ;;  %682 = vmatpush.msra.mxu2 %v538_v48  ;;  %v722_v28 = vld [vmem:[%s1161_s9] ss:$0 sm:$0xff] }
  0x64   :  { %698 = vmatpush.msra.mxu3 %v522_v41  ;;  %557 = vmatpush.msra.mxu0 %v538_v48 }
  0x65   :  { %579 = vmatpush.msra.mxu1 %v523_v33  ;;  %683 = vmatpush.msra.mxu2 %v537_v11 }
  0x66   :  { %699 = vmatpush.msra.mxu3 %v521_v47  ;;  %558 = vmatpush.msra.mxu0 %v537_v11 }
  0x67   :  { %580 = vmatpush.msra.mxu1 %v522_v41  ;;  %684 = vmatpush.msra.mxu2 %v536_v13 }
  0x68   :  { %700 = vmatpush.msra.mxu3 %v520_v57  ;;  %559 = vmatpush.msra.mxu0 %v536_v13 }
  0x69   :  { %581 = vmatpush.msra.mxu1 %v521_v47  ;;  %685 = vmatpush.msra.mxu2 %v535_v15 }
  0x6a   :  { %701 = vmatpush.msra.mxu3 %v519_v12  ;;  %560 = vmatpush.msra.mxu0 %v535_v15 }
  0x6b   :  { %582 = vmatpush.msra.mxu1 %v520_v57  ;;  %686 = vmatpush.msra.mxu2 %v534_v17  ;;  %v609_v57 = vld [vmem:[#allocation6] sm:$0xff] }
  0x6c   :  { %702 = vmatpush.msra.mxu3 %v518_v14  ;;  %561 = vmatpush.msra.mxu0 %v534_v17 }
  0x6d   :  { %583 = vmatpush.msra.mxu1 %v519_v12  ;;  %687 = vmatpush.msra.mxu2 %v533_v19 }
  0x6e   :  { %703 = vmatpush.msra.mxu3 %v517_v16  ;;  %562 = vmatpush.msra.mxu0 %v533_v19 }
  0x6f   :  { %584 = vmatpush.msra.mxu1 %v518_v14  ;;  %688 = vmatpush.msra.mxu2 %v532_v20 }
  0x70   :  { %704 = vmatpush.msra.mxu3 %v516_v18  ;;  %563 = vmatpush.msra.mxu0 %v532_v20 }
  0x71   :  { %585 = vmatpush.msra.mxu1 %v517_v16 }
  0x73   :  { %586 = vmatpush.msra.mxu1 %v516_v18 }
  0xab   :  { %v223_v32 = vpop.f32.mrf.mxu0 }
  0xac   :  { %v224_v37 = vadd.f32 %v223_v32, %v191_v26 }
  0xae   :  { %v246_v40 = vpop.f32.mrf.mxu1  ;;  %v316_v43 = vmul.f32 %v308_v30, %v224_v37  ;;  %vm299_vm1 = vcmp.gt.f32.partialorder %v224_v37, 0.0 }
  0xaf   :  { %v247_v44 = vadd.f32 %v246_v40, %v192_v31  ;;  %v269_v45 = vpop.f32.mrf.mxu2 }
  0xb0   :  { %v292_v46 = vpop.f32.mrf.mxu3  ;;  %v270_v49 = vadd.f32 %v269_v45, %v193_v35  ;;  %v324_v52 = vsel %vm299_vm1, %v224_v37, %v316_v43 }
  0xb1   :  { %v293_v50 = vadd.f32 %v292_v46, %v194_v36  ;;  %v317_v51 = vmul.f32 %v309_v38, %v247_v44  ;;  %384 = vmatmul.f32.vlgmr.msrb.gmra.mxu0 %v324_v52  ;;  %vm300_vm2 = vcmp.gt.f32.partialorder %v247_v44, 0.0 }
  0xb2   :  { %v318_v53 = vmul.f32 %v310_v39, %v270_v49  ;;  %vm301_vm3 = vcmp.gt.f32.partialorder %v270_v49, 0.0 }
  0xb3   :  { %v319_v54 = vmul.f32 %v311_v42, %v293_v50  ;;  %vm302_vm4 = vcmp.gt.f32.partialorder %v293_v50, 0.0  ;;  %v226_v55 = vpop.f32.mrf.mxu0  ;;  %v325_v56 = vsel %vm300_vm2, %v247_v44, %v317_v51 }
  0xb4   :  { %v326_v58 = vsel %vm301_vm3, %v270_v49, %v318_v53  ;;  %v227_v60 = vadd.f32 %v226_v55, %v191_v26  ;;  %407 = vmatmul.f32.vlgmr.msrb.gmra.mxu1 %v325_v56  ;;  %v724_v49 = vld [vmem:[%s1165_s13] ss:$0 sm:$0xff]  ;;  %v600_v53 = vlaneseq }
  0xb5   :  { %v327_v59 = vsel %vm302_vm4, %v293_v50, %v319_v54  ;;  %476 = vmatmul.f32.vlgmr.msrb.gmra.mxu2 %v326_v58  ;;  %v625_v54 = vld [vmem:[#allocation2] sm:$0x1] }
  0xb6   :  { %499 = vmatmul.f32.vlgmr.msrb.gmra.mxu3 %v327_v59  ;;  %v249_v61 = vpop.f32.mrf.mxu1  ;;  %vm303_vm5 = vcmp.gt.f32.partialorder %v227_v60, 0.0  ;;  %v320_v63 = vmul.f32 %v308_v30, %v227_v60  ;;  %705 = vpush %v625_v54  ;;  %v601_v56 = vand.u32 127, %v600_v53 }
  0xb7   :  { %v250_v62 = vadd.f32 %v249_v61, %v192_v31  ;;  %v272_v0 = vpop.f32.mrf.mxu2 }
  0xb8   :  { %v295_v1 = vpop.f32.mrf.mxu3  ;;  %v273_v2 = vadd.f32 %v272_v0, %v193_v35  ;;  %v328_v4 = vsel %vm303_vm5, %v227_v60, %v320_v63  ;;  %v723_v35 = vld [vmem:[%s1162_s10] ss:$0 sm:$0xff]  ;;  %vm603_vm13 = vcmp.eq.s32.totalorder %v601_v56, 4  ;;  %vm602_vm14 = vcmp.lt.s32.totalorder %v601_v56, 4 }
  0xb9   :  { %v296_v3 = vadd.f32 %v295_v1, %v194_v36  ;;  %vm304_vm6 = vcmp.gt.f32.partialorder %v250_v62, 0.0  ;;  %387 = vmatmul.f32.gmra.mxu0 %v328_v4  ;;  %v321_v5 = vmul.f32 %v309_v38, %v250_v62  ;;  %vm604_vm15 = vcmp.eq.s32.totalorder %v601_v56, 5 }
  0xba   :  { %vm305_vm7 = vcmp.gt.f32.partialorder %v273_v2, 0.0  ;;  %v322_v6 = vmul.f32 %v310_v39, %v273_v2 }
  0xbb   :  { %vm306_vm8 = vcmp.gt.f32.partialorder %v296_v3, 0.0  ;;  %v323_v7 = vmul.f32 %v311_v42, %v296_v3  ;;  %v329_v8 = vsel %vm304_vm6, %v250_v62, %v321_v5  ;;  %v725_v62 = vld [vmem:[%s1166_s14] ss:$0 sm:$0xff] }
  0xbc   :  { %v330_v9 = vsel %vm305_vm7, %v273_v2, %v322_v6  ;;  %410 = vmatmul.f32.gmra.mxu1 %v329_v8  ;;  %v610_v6 = vld [vmem:[#allocation6 + $0x8] sm:$0xff] }
  0xbd   :  { %v331_v10 = vsel %vm306_vm8, %v296_v3, %v323_v7  ;;  %479 = vmatmul.f32.gmra.mxu2 %v330_v9 }
  0xbe   :  { %502 = vmatmul.f32.gmra.mxu3 %v331_v10 }
  0xe7   :  { %s706_s14 = spop %705 }
  0xe8   :  { %v629_v15 = vstv %s706_s14 }
 0x12e   :  { %v385_v22 = vpop.f32.mrf.mxu0 }
 0x12f   :  { %v386_v23 = vadd.f32 %v720_v21, %v385_v22 }
 0x131   :  { %v408_v25 = vpop.f32.mrf.mxu1 }
 0x132   :  { %v409_v26 = vadd.f32 %v408_v25, %v386_v23 }
 0x134   :  { %vm415_vm9 = vcmp.gt.f32.partialorder %v409_v26, 0.0  ;;  %v420_v27 = vmul.f32 %v721_v24, %v409_v26 }
 0x136   :  { %v388_v29 = vpop.f32.mrf.mxu0  ;;  %v422_v30 = vsel %vm415_vm9, %v409_v26, %v420_v27 }
 0x137   :  { %v389_v31 = vadd.f32 %v720_v21, %v388_v29  ;;  %587 = vmatmul.f32.vlgmr.msra.gmra.mxu1 %v422_v30 }
 0x138   :  { %v477_v32 = vpop.f32.mrf.mxu2 }
 0x139   :  { %v500_v33 = vpop.f32.mrf.mxu3  ;;  %v478_v34 = vadd.f32 %v722_v28, %v477_v32  ;;  %v411_v36 = vpop.f32.mrf.mxu1 }
 0x13a   :  { %v412_v37 = vadd.f32 %v411_v36, %v389_v31 }
 0x13b   :  { %v501_v38 = vadd.f32 %v500_v33, %v478_v34 }
 0x13c   :  { %vm416_vm10 = vcmp.gt.f32.partialorder %v412_v37, 0.0  ;;  %v421_v39 = vmul.f32 %v721_v24, %v412_v37 }
 0x13d   :  { %vm507_vm11 = vcmp.gt.f32.partialorder %v501_v38, 0.0  ;;  %v512_v40 = vmul.f32 %v723_v35, %v501_v38 }
 0x13e   :  { %v423_v41 = vsel %vm416_vm10, %v412_v37, %v421_v39 }
 0x13f   :  { %v514_v42 = vsel %vm507_vm11, %v501_v38, %v512_v40  ;;  %590 = vmatmul.f32.vlgmr.msra.gmra.mxu3 %v423_v41 }
 0x140   :  { %v480_v43 = vpop.f32.mrf.mxu2  ;;  %564 = vmatmul.f32.vlgmr.msra.gmra.mxu0 %v514_v42 }
 0x141   :  { %v481_v44 = vadd.f32 %v722_v28, %v480_v43  ;;  %v503_v45 = vpop.f32.mrf.mxu3 }
 0x143   :  { %v504_v46 = vadd.f32 %v503_v45, %v481_v44 }
 0x145   :  { %vm508_vm12 = vcmp.gt.f32.partialorder %v504_v46, 0.0  ;;  %v513_v47 = vmul.f32 %v723_v35, %v504_v46 }
 0x147   :  { %v515_v48 = vsel %vm508_vm12, %v504_v46, %v513_v47 }
 0x148   :  { %567 = vmatmul.f32.vlgmr.msra.gmra.mxu2 %v515_v48 }
 0x1b4   :  { %v588_v50 = vpop.f32.mrf.mxu1 }
 0x1bd   :  { %v565_v51 = vpop.f32.mrf.mxu0 }
 0x1be   :  { %v589_v52 = vadd.f32 %v588_v50, %v565_v51 }
 0x1c0   :  { %v598_v55 = vadd.f32 %v724_v49, %v589_v52 }
 0x1c2   :  { %726 = vtanh.f32 %v598_v55  ;;  %v632_v59 = vsel %vm603_vm13, %v598_v55, 0.0  ;;  %v591_v0 = vpop.f32.mrf.mxu3 }
 0x1c8   :  { %v727_v58 = vpop.eup %726 }
 0x1c9   :  { %v607_v60 = vsel %vm602_vm14, %v727_v58, 0.0 }
 0x1ca   :  { %v611_v61 = vsub.f32 %v609_v57, %v607_v60  ;;  %v634_v63 = vadd.f32 %v632_v59, %v607_v60 }
 0x1cb   :  { %v568_v1 = vpop.f32.mrf.mxu2 }
 0x1cc   :  { %v592_v2 = vadd.f32 %v591_v0, %v568_v1  ;;  %v613_v3 = vmul.f32 %v611_v61, %v611_v61 }
 0x1ce   :  { %v599_v4 = vadd.f32 %v724_v49, %v592_v2  ;;  %v619_v5 = vmul.f32 %v725_v62, %v613_v3 }
 0x1d0   :  { %728 = vtanh.f32 %v599_v4  ;;  %621 = vadd.xlane.f32.xlu0 %v619_v5  ;;  %v633_v8 = vsel %vm603_vm13, %v599_v4, 0.0 }
 0x1d6   :  { %v729_v7 = vpop.eup %728 }
 0x1d7   :  { %v608_v9 = vsel %vm602_vm14, %v729_v7, 0.0 }
 0x1d8   :  { %v612_v10 = vsub.f32 %v610_v6, %v608_v9  ;;  %v635_v11 = vadd.f32 %v633_v8, %v608_v9 }
 0x1da   :  { %v614_v12 = vmul.f32 %v612_v10, %v612_v10 }
 0x1dc   :  { %v620_v13 = vmul.f32 %v725_v62, %v614_v12 }
 0x1de   :  { %623 = vadd.xlane.f32.xlu0 %v620_v13 }
 0x243   :  { %v622_v14 = vpop.xlane.xlu0 %621 }
 0x244   :  { %v627_v16 = vmul.f32 0.5, %v622_v14 }
 0x246   :  { %v630_v17 = vsub.f32 %v629_v15, %v627_v16 }
 0x248   :  { %v636_v18 = vsel %vm604_vm15, %v630_v17, 0.0 }
 0x249   :  { %v638_v19 = vadd.f32 %v636_v18, %v634_v63 }
 0x24b   :  { %640 = vst [vmem:[#allocation17] sm:$0xff] %v638_v19 }
 0x251   :  { %v624_v20 = vpop.xlane.xlu0 %623 }
 0x252   :  { %v628_v21 = vmul.f32 0.5, %v624_v20 }
 0x254   :  { %v631_v22 = vsub.f32 %v629_v15, %v628_v21 }
 0x256   :  { %v637_v23 = vsel %vm604_vm15, %v631_v22, 0.0 }
 0x257   :  { %v639_v24 = vadd.f32 %v637_v23, %v635_v11 }
 0x259   :  { %641 = vst [vmem:[#allocation17 + $0x8] sm:$0xff] %v639_v24 }
 0x25a   :  { %654 = dma.vmem_to_hbm [thread:$0]  %s647_s22, 256, %s649_s24, [#allocation5], %s959_s15, %s959_s15, %s960_s0  }
 0x25b   :  { %956 = dma.done.wait [#allocation5], 256  }
 0x25c   :  { %957 = vsyncadd [#allocation5], 4294967040 }
 0x25d   :  { %659 = vsyncpa [#allocation4], 1 }
 0x25e   :  { %660 = vsyncpa [#allocation7], 1 }
 0x25f   :  { %661 = vsyncpa [#allocation10], 1 }
 0x260   :  { %662 = vsyncpa [#allocation13], 1 }
 0x261   :  { %663 = vsyncpa [#allocation16], 1 }
 0x262   :  { %664 = vsyncpa [#allocation5], 1 }

</bundles_post_ra>
